<compile_context>
chip_gen: v6e
topology: v6e:2x2x1
jax: 0.10.0
libtpu: 0.0.40
codegen_flags: <defaults>
</compile_context>

<pallas_src>
import functools

import jax
import jax.numpy as jnp
from jax.experimental import pallas as pl
from jax.experimental.pallas import tpu as pltpu


# ----------------------------------------------------------------------------
# Feature probe: single-buffered grid-invariant weight blocks (pipeline_mode).
# ----------------------------------------------------------------------------
def _probe_kernel(x_ref, o_ref):
    o_ref[...] = x_ref[...] + 1.0


_single_buffer_ok = None


def _supports_single_buffered_weights():
    """One-time probe of pipeline_mode=pl.Buffered(1) on a tiny throwaway kernel, so the
    real pallas_call never sits inside a bare `except Exception` (review item)."""
    global _single_buffer_ok
    if _single_buffer_ok is None:
        try:
            out = pl.pallas_call(
                _probe_kernel,
                grid=(1,),
                in_specs=[pl.BlockSpec((8, 128), lambda i: (0, 0),
                                       pipeline_mode=pl.Buffered(1))],
                out_specs=pl.BlockSpec((8, 128), lambda i: (0, 0)),
                out_shape=jax.ShapeDtypeStruct((8, 128), jnp.float32),
            )(jnp.zeros((8, 128), jnp.float32))
            jax.block_until_ready(out)
            _single_buffer_ok = True
        except Exception:
            # pipeline_mode / Buffered(1) unsupported on this jax -> default double buffering
            _single_buffer_ok = False
    return _single_buffer_ok


# ----------------------------------------------------------------------------
# Stage 1 kernel: one (group, instance-tile) per grid step, online softmax.
# ----------------------------------------------------------------------------
def _group_kernel(x_ref, w1_ref, wvu_ref, bvu_ref, wa_ref, ba_ref,
                  afeat_ref, m_sc, l_sc, acc_sc, *, n_valid, needs_mask, att_D):
    t = pl.program_id(1)

    @pl.when(t == 0)
    def _():
        m_sc[...] = jnp.full_like(m_sc, -jnp.inf)
        l_sc[...] = jnp.zeros_like(l_sc)
        acc_sc[...] = jnp.zeros_like(acc_sc)

    x = x_ref[...]                                  # (tile_n, feat_dim), compute dtype
    cdt = x.dtype
    tile_n = x.shape[0]

    # DimReduction: relu(x @ W1)  (Linear, bias=False) -- f32 accumulation on the MXU
    mid = jnp.maximum(
        jnp.dot(x, w1_ref[...], preferred_element_type=jnp.float32), 0.0)
    mid_c = mid.astype(cdt)                         # bf16 copy feeds the remaining MXU work

    # Fused gated attention: one (tile_n, 2D) matmul fills the 256-wide MXU on v6e/v7x.
    vu = jnp.dot(mid_c, wvu_ref[...], preferred_element_type=jnp.float32) + bvu_ref[...]
    av = jnp.tanh(vu[:, :att_D])                    # VPU/EUP math stays f32 (v5e: no bf16 VPU)
    au = jax.nn.sigmoid(vu[:, att_D:])

    # score = (av*au) @ wa + ba ; N=1 output -> VPU multiply + lane reduction, MXU stays free
    s = jnp.sum((av * au) * wa_ref[...], axis=-1, keepdims=True) + ba_ref[0, 0]  # (tile_n, 1)

    if needs_mask:   # padded rows (pad-to-tile) get -inf scores -> exp() contributes 0
        row = t * tile_n + jax.lax.broadcasted_iota(jnp.int32, s.shape, 0)
        s = jnp.where(row < n_valid, s, -jnp.inf)

    # online softmax over the instance axis + weighted-feature accumulation
    m_prev = m_sc[...]                                            # (1, 1)
    m_new = jnp.maximum(m_prev, jnp.max(s, axis=0, keepdims=True))
    alpha = jnp.exp(m_prev - m_new)                               # (1, 1)
    p = jnp.exp(s - m_new)                                        # (tile_n, 1) f32
    l_sc[...] = alpha * l_sc[...] + jnp.sum(p, axis=0, keepdims=True)

    # attention-weighted pooling on the MXU: contract instance axis of p with mid -> (1, F)
    pooled = jax.lax.dot_general(
        p.astype(cdt), mid_c,
        dimension_numbers=(((0,), (0,)), ((), ())),
        preferred_element_type=jnp.float32)
    acc_sc[...] = alpha * acc_sc[...] + pooled
    m_sc[...] = m_new

    @pl.when(t == pl.num_programs(1) - 1)
    def _():
        afeat_ref[0] = (acc_sc[...] *
                        pl.reciprocal(l_sc[...], approx=True)).astype(afeat_ref.dtype)


# ----------------------------------------------------------------------------
# Stage 2 kernel: fused (sub-classifier | bag attention V | U) matmul + bag head.
# ----------------------------------------------------------------------------
def _bag_kernel(f_ref, wfused_ref, bfused_ref, wa_ref, ba_ref, wcls_ref, bcls_ref,
                sub_pred_ref, bag_pred_ref, bag_afeat_ref, *, att_D, num_classes):
    f = f_ref[...]                                         # (num_group, feat_dim)

    # one fused matmul: [att2_Wv | att2_Wu | sub_Wc]  -> lane-aligned slices at 0, D, 2D
    z = jnp.dot(f, wfused_ref[...], preferred_element_type=jnp.float32) + bfused_ref[...]
    av = jnp.tanh(z[:, :att_D])
    au = jax.nn.sigmoid(z[:, att_D:2 * att_D])
    sub_pred_ref[...] = z[:, 2 * att_D:2 * att_D + num_classes]

    s = jnp.sum((av * au) * wa_ref[...], axis=-1, keepdims=True) + ba_ref[0, 0]   # (G, 1)
    m = jnp.max(s, axis=0, keepdims=True)
    e = jnp.exp(s - m)
    att = e / jnp.sum(e, axis=0, keepdims=True)            # (G, 1)

    afeat = jnp.sum(f * att, axis=0, keepdims=True)        # (1, feat_dim) == AA @ f
    bag_afeat_ref[...] = afeat
    bag_pred_ref[...] = jnp.dot(afeat, wcls_ref[...],
                                preferred_element_type=jnp.float32) + bcls_ref[...]


# ----------------------------------------------------------------------------
# Generation-aware tiling / VMEM budgeting
# ----------------------------------------------------------------------------
def _stage1_vmem_plan(n_per, feat_dim, att_D, comp_bytes, single_buffer_weights,
                      tile_cap=None):
    """Pick the instance-tile size and vmem_limit from the device's VMEM capacity minus the
    weight footprint (single- or double-buffered) and the double-buffered x tile."""
    try:
        vmem_cap = int(pltpu.get_tpu_info().vmem_capacity_bytes)
    except Exception:
        vmem_cap = 64 * 1024 * 1024          # assume the tightest current gen (v7x per-TC)
    budget = (vmem_cap * 3) // 4             # headroom for compiler-internal scratch

    wmult = 1 if single_buffer_weights else 2
    weight_bytes = wmult * (comp_bytes * feat_dim * (feat_dim + 2 * att_D)   # W1 + Wv|Wu
                            + 4 * (3 * att_D + 8))                           # f32 biases/wa
    per_row = (2 * feat_dim * comp_bytes     # x tile, double-buffered DMA
               + feat_dim * 4                # f32 mid
               + feat_dim * comp_bytes       # mid cast back to the MXU compute dtype
               + 4 * att_D * 4               # vu / av / au intermediates (f32)
               + 64)                         # score / prob columns
    avail = budget - weight_bytes - (1 << 20)
    max_rows = max(8, avail // per_row)

    # 512-row tiles already reach ~85% of HBM roofline; 128 MiB parts (v5e/v6e) can take 1024.
    target = 1024 if vmem_cap >= (96 << 20) else 512
    tile_n = min(target, max_rows, max(n_per, 8))
    if tile_cap is not None:
        tile_n = min(tile_n, max(int(tile_cap), 8))
    tile_n = max(8, (int(tile_n) // 8) * 8)              # keep the (8, 128) sublane rule
    n_tiles = -(-n_per // tile_n)

    need = weight_bytes + per_row * tile_n + (2 << 20)
    vmem_limit = int(min(budget, max(need, 32 << 20)))
    return tile_n, int(n_tiles), vmem_limit


# ----------------------------------------------------------------------------
# pallas_call wrappers
# ----------------------------------------------------------------------------
def _run_stage1(x_grouped, w1, wvu, bvu, wa_row, ba, *,
                n_valid, tile_n, att_D, single_buffer_weights, vmem_limit_bytes):
    num_group, n_pad, feat_dim = x_grouped.shape
    n_tiles = n_pad // tile_n
    needs_mask = (n_pad != n_valid)

    # grid-invariant weights: single-buffer them to free VMEM headroom for the x tile
    wkwargs = {"pipeline_mode": pl.Buffered(1)} if single_buffer_weights else {}

    def wspec(shape):
        return pl.BlockSpec(shape, lambda g, t: (0,) * len(shape), **wkwargs)

    kernel = functools.partial(_group_kernel, n_valid=n_valid,
                               needs_mask=needs_mask, att_D=att_D)

    # TODO(synk): if num_group == 1 on v7x, split each group's instance axis into 2 parallel
    #             halves (+ tiny host-side merge of the (m,l,acc) partials) to use both TCs.
    afeats = pl.pallas_call(
        kernel,
        out_shape=jax.ShapeDtypeStruct((num_group, 1, feat_dim), jnp.float32),
        grid=(num_group, n_tiles),
        in_specs=[
            # instance tile; leading group dim squeezed instead of x_ref[0]
            pl.BlockSpec((None, tile_n, feat_dim), lambda g, t: (g, t, 0)),
            wspec((feat_dim, feat_dim)),       # dimReduction.fc1 (W^T), compute dtype
            wspec((feat_dim, 2 * att_D)),      # fused attention [V | U] (W^T), compute dtype
            wspec((1, 2 * att_D)),             # fused bias [bv | bu], f32
            wspec((1, att_D)),                 # attention.weights as a (1, D) row, f32
            pl.BlockSpec(memory_space=pltpu.MemorySpace.SMEM),   # scalar bias in SMEM
        ],
        out_specs=pl.BlockSpec((1, 1, feat_dim), lambda g, t: (g, 0, 0)),
        scratch_shapes=[
            pltpu.VMEM((1, 1), jnp.float32),          # running max  m
            pltpu.VMEM((1, 1), jnp.float32),          # running sum  l
            pltpu.VMEM((1, feat_dim), jnp.float32),   # running weighted-feature acc
        ],
        compiler_params=pltpu.CompilerParams(
            dimension_semantics=("parallel", "arbitrary"),   # groups shard across v7x's 2 TCs
            vmem_limit_bytes=int(vmem_limit_bytes),
        ),
    )(x_grouped, w1, wvu, bvu, wa_row, ba)
    return afeats.reshape(num_group, feat_dim)


def _run_stage2(afeats, params, *, att_D):
    num_group, feat_dim = afeats.shape
    num_classes = params["sub_wc"].shape[1]

    # fuse [att2_Wv | att2_Wu | sub_Wc] (lane-aligned slices) and the matching biases
    wfused = jnp.concatenate(
        [params["att2_wv"], params["att2_wu"], params["sub_wc"]], axis=1)
    bfused = jnp.concatenate(
        [params["att2_bv"], params["att2_bu"], params["sub_bc"]], axis=1)

    vmem = pl.BlockSpec(memory_space=pltpu.MemorySpace.VMEM)
    smem = pl.BlockSpec(memory_space=pltpu.MemorySpace.SMEM)
    kernel = functools.partial(_bag_kernel, att_D=att_D, num_classes=num_classes)

    sub_preds, bag_pred, bag_afeat = pl.pallas_call(
        kernel,
        out_shape=[
            jax.ShapeDtypeStruct((num_group, num_classes), jnp.float32),
            jax.ShapeDtypeStruct((1, num_classes), jnp.float32),
            jax.ShapeDtypeStruct((1, feat_dim), jnp.float32),
        ],
        in_specs=[vmem,                 # group AFS features
                  vmem, vmem,           # fused [Wv|Wu|Wc], fused bias
                  vmem, smem,           # attention weights row + scalar bias (SMEM)
                  vmem, vmem],          # bag classifier
        out_specs=[vmem, vmem, vmem],
    )(
        afeats, wfused, bfused,
        params["att2_wa"].reshape(1, -1), params["att2_ba"],
        params["cls_wc"], params["cls_bc"],
    )
    return sub_preds, bag_pred, bag_afeat


# ----------------------------------------------------------------------------
# Wrapper
# ----------------------------------------------------------------------------
def dtfd_mil_forward(x, params, *, num_group, compute_dtype=jnp.bfloat16,
                     tile_n_override=None):
    """x: (N, feat_dim) float32. Returns ((bag_pred, bag_afeat), sub_preds)."""
    N, feat_dim = x.shape
    assert N % num_group == 0, "demo assumes equal group sizes (np.array_split allows ragged)"
    n_per = N // num_group
    att_D = params["att1_wv"].shape[1]
    num_classes = params["sub_wc"].shape[1]

    # deterministic stand-in for random.shuffle + np.array_split
    # TODO(synk): avoid the permuted HBM copy by passing `perm` through
    #             PrefetchScalarGridSpec + pl.Element row gather (largest relative win on v5e).
    perm = jax.random.permutation(jax.random.PRNGKey(123), N)
    x_grouped = x[perm].reshape(num_group, n_per, feat_dim)

    comp = jnp.dtype(compute_dtype) if compute_dtype is not None else jnp.dtype(x.dtype)

    single_buf = _supports_single_buffered_weights()
    tile_n, n_tiles, vmem_limit = _stage1_vmem_plan(
        n_per, feat_dim, att_D, comp.itemsize, single_buf, tile_cap=tile_n_override)

    n_pad = tile_n * n_tiles
    if n_pad != n_per:
        # pad-to-tile + in-kernel -inf mask replaces the old whole-group ragged fallback
        x_grouped = jnp.pad(x_grouped, ((0, 0), (0, n_pad - n_per), (0, 0)))
    x_grouped = x_grouped.astype(comp)

    # every stage-1 MXU operand in the compute dtype (bf16 by default); accumulation stays f32
    w1 = params["dr_w1"].astype(comp)
    wvu = jnp.concatenate([params["att1_wv"], params["att1_wu"]], axis=1).astype(comp)
    bvu = jnp.concatenate([params["att1_bv"], params["att1_bu"]], axis=1)

    afeats = _run_stage1(
        x_grouped, w1, wvu, bvu,
        params["att1_wa"].reshape(1, -1), params["att1_ba"],
        n_valid=n_per, tile_n=tile_n, att_D=att_D,
        single_buffer_weights=single_buf, vmem_limit_bytes=vmem_limit)

    sub_preds, bag_pred, bag_afeat = _run_stage2(afeats, params, att_D=att_D)

    # match torch.squeeze semantics of Attention_with_Classifier
    return (bag_pred.reshape(num_classes), bag_afeat.reshape(feat_dim)), sub_preds


# ----------------------------------------------------------------------------
# Pure-JAX reference (same math, for a correctness sanity check)
# ----------------------------------------------------------------------------
def _reference_forward(x, params, *, num_group):
    N, feat_dim = x.shape
    n_per = N // num_group
    perm = jax.random.permutation(jax.random.PRNGKey(123), N)
    xg = x[perm].reshape(num_group, n_per, feat_dim)

    def attention(h, wv, bv, wu, bu, wa, ba):
        av = jnp.tanh(h @ wv + bv)
        au = jax.nn.sigmoid(h @ wu + bu)
        s = (av * au) @ wa + ba
        return jax.nn.softmax(s, axis=0)

    afeats, sub_preds = [], []
    for g in range(num_group):
        mid = jnp.maximum(xg[g] @ params["dr_w1"], 0.0)
        att = attention(mid, params["att1_wv"], params["att1_bv"],
                        params["att1_wu"], params["att1_bu"],
                        params["att1_wa"], params["att1_ba"])
        af = jnp.sum(mid * att, axis=0, keepdims=True)
        afeats.append(af)
        sub_preds.append(af @ params["sub_wc"] + params["sub_bc"])
    f = jnp.concatenate(afeats, axis=0)
    sub_preds = jnp.concatenate(sub_preds, axis=0)
    att2 = attention(f, params["att2_wv"], params["att2_bv"],
                     params["att2_wu"], params["att2_bu"],
                     params["att2_wa"], params["att2_ba"])
    bag_afeat = jnp.sum(f * att2, axis=0)
    bag_pred = bag_afeat @ params["cls_wc"] + params["cls_bc"].reshape(-1)
    return (bag_pred, bag_afeat), sub_preds


def init_params(key, feat_dim, num_classes, D=128):
    """Deterministic synthetic parameters (stored pre-transposed: (in, out))."""
    ks = jax.random.split(key, 16)
    s = lambda k, shape, scale=0.05: (scale * jax.random.normal(k, shape)).astype(jnp.float32)
    return {
        # DimReduction.fc1 (no bias)
        "dr_w1": s(ks[0], (feat_dim, feat_dim)),
        # first-tier Attention_Gated (L=feat_dim, D=128, K=1)
        "att1_wv": s(ks[1], (feat_dim, D)), "att1_bv": s(ks[2], (1, D)),
        "att1_wu": s(ks[3], (feat_dim, D)), "att1_bu": s(ks[4], (1, D)),
        "att1_wa": s(ks[5], (D, 1)),        "att1_ba": s(ks[6], (1, 1)),
        # subClassifier
        "sub_wc": s(ks[7], (feat_dim, num_classes)), "sub_bc": s(ks[8], (1, num_classes)),
        # attCls.attention
        "att2_wv": s(ks[9], (feat_dim, D)),  "att2_bv": s(ks[10], (1, D)),
        "att2_wu": s(ks[11], (feat_dim, D)), "att2_bu": s(ks[12], (1, D)),
        "att2_wa": s(ks[13], (D, 1)),        "att2_ba": s(ks[14], (1, 1)),
        # attCls.classifier
        "cls_wc": s(ks[15], (feat_dim, num_classes)),
        "cls_bc": jnp.zeros((1, num_classes), jnp.float32),
    }


if __name__ == "__main__":
    feat_dim = 128       # module uses this for both feat_dim and m_dim
    num_classes = 2
    num_group = 2        # >= 2 keeps both v7x TensorCores busy on the "parallel" group axis

    key = jax.random.PRNGKey(0)
    kx, kp = jax.random.split(key)
    params = init_params(kp, feat_dim, num_classes)

    # --- small demo bag: exercises pad-to-tile (4 -> 8 rows per group) + mask, single tile
    x = jax.random.normal(kx, (8, feat_dim), dtype=jnp.float32)
    (bag_pred, bag_afeat), sub_preds = dtfd_mil_forward(x, params, num_group=num_group)
    jax.block_until_ready((bag_pred, bag_afeat, sub_preds))

    assert bag_pred.shape == (num_classes,)
    assert bag_afeat.shape == (feat_dim,)
    assert sub_preds.shape == (num_group, num_classes)

    (rp, ra), rs = _reference_forward(x, params, num_group=num_group)
    err = max(float(jnp.max(jnp.abs(bag_pred - rp))),
              float(jnp.max(jnp.abs(bag_afeat - ra))),
              float(jnp.max(jnp.abs(sub_preds - rs))))
    assert err < 3e-2, f"small-bag mismatch vs reference: {err}"   # bf16 MXU vs f32 ref

    # --- second check: multi-tile online softmax + padding mask (n_per=36, tile=16 -> 3 tiles)
    x_big = jax.random.normal(jax.random.PRNGKey(1), (72, feat_dim), dtype=jnp.float32)
    (bp2, ba2), sp2 = dtfd_mil_forward(x_big, params, num_group=num_group,
                                       tile_n_override=16)
    jax.block_until_ready((bp2, ba2, sp2))
    (rp2, ra2), rs2 = _reference_forward(x_big, params, num_group=num_group)
    err2 = max(float(jnp.max(jnp.abs(bp2 - rp2))),
               float(jnp.max(jnp.abs(ba2 - ra2))),
               float(jnp.max(jnp.abs(sp2 - rs2))))
    assert err2 < 3e-2, f"multi-tile mismatch vs reference: {err2}"

    print("KERNEL_OK")
</pallas_src>

<mosaic_0001>
module attributes {stable_mosaic.version = 11 : i64} {
  func.func @_probe_kernel(%arg0: i32, %arg1: memref<8x128xf32, #tpu.memory_space<vmem>>, %arg2: memref<8x128xf32, #tpu.memory_space<vmem>>) attributes {dimension_semantics = [#tpu.dimension_semantics<arbitrary>], iteration_bounds = array<i64: 1>, scalar_prefetch = 0 : i64, scratch_operands = 0 : i64, tpu.core_type = #tpu.core_type<tc>, window_params = [{pipeline_mode = #tpu.pipeline_mode<synchronous>, transform_indices = @transform_0, window_bounds = array<i64: 8, 128>}, {pipeline_mode = #tpu.pipeline_mode<synchronous>, transform_indices = @transform_1, window_bounds = array<i64: 8, 128>}]} {
    %c0 = arith.constant 0 : index
    %c0_0 = arith.constant 0 : index
    %0 = vector.load %arg1[%c0, %c0_0] : memref<8x128xf32, #tpu.memory_space<vmem>>, vector<8x128xf32>
    %cst = arith.constant 1.000000e+00 : f32
    %1 = vector.broadcast %cst : f32 to vector<8x128xf32>
    %2 = arith.addf %0, %1 : vector<8x128xf32>
    %c0_1 = arith.constant 0 : index
    %c0_2 = arith.constant 0 : index
    %3 = vector.load %arg2[%c0_1, %c0_2] : memref<8x128xf32, #tpu.memory_space<vmem>>, vector<8x128xf32>
    tpu.vector_store %arg2[%c0_1, %c0_2], %2 {strides = array<i32>} : memref<8x128xf32, #tpu.memory_space<vmem>>, vector<8x128xf32>,
    return
  }
  func.func @transform_0(%arg0: i32) -> (i32, i32) {
    %c0_i32 = arith.constant 0 : i32
    %c0_i32_0 = arith.constant 0 : i32
    %c0_i32_1 = arith.constant 0 : i32
    return %c0_i32, %c0_i32_0 : i32, i32
  }
  func.func @transform_1(%arg0: i32) -> (i32, i32) {
    %c0_i32 = arith.constant 0 : i32
    %c0_i32_0 = arith.constant 0 : i32
    %c0_i32_1 = arith.constant 0 : i32
    return %c0_i32, %c0_i32_0 : i32, i32
  }
}

module attributes {stable_mosaic.version = 11 : i64} {
  func.func @_group_kernel(%arg0: i32, %arg1: i32, %arg2: memref<1x8x128xbf16, #tpu.memory_space<vmem>>, %arg3: memref<128x128xbf16, #tpu.memory_space<vmem>>, %arg4: memref<128x256xbf16, #tpu.memory_space<vmem>>, %arg5: memref<1x256xf32, #tpu.memory_space<vmem>>, %arg6: memref<1x128xf32, #tpu.memory_space<vmem>>, %arg7: memref<1x1xf32, #tpu.memory_space<smem>>, %arg8: memref<1x1x128xf32, #tpu.memory_space<vmem>>, %arg9: memref<1x1xf32, #tpu.memory_space<vmem>>, %arg10: memref<1x1xf32, #tpu.memory_space<vmem>>, %arg11: memref<1x128xf32, #tpu.memory_space<vmem>>) attributes {dimension_semantics = [#tpu.dimension_semantics<parallel>, #tpu.dimension_semantics<arbitrary>], iteration_bounds = array<i64: 2, 1>, scalar_prefetch = 0 : i64, scratch_operands = 3 : i64, tpu.core_type = #tpu.core_type<tc>, window_params = [{transform_indices = @transform_0, window_bounds = array<i64: 1, 8, 128>}, {pipeline_mode = #tpu.pipeline_mode<synchronous>, transform_indices = @transform_1, window_bounds = array<i64: 128, 128>}, {pipeline_mode = #tpu.pipeline_mode<synchronous>, transform_indices = @transform_2, window_bounds = array<i64: 128, 256>}, {pipeline_mode = #tpu.pipeline_mode<synchronous>, transform_indices = @transform_3, window_bounds = array<i64: 1, 256>}, {pipeline_mode = #tpu.pipeline_mode<synchronous>, transform_indices = @transform_4, window_bounds = array<i64: 1, 128>}, {transform_indices = @transform_5, window_bounds = array<i64: 1, 1>}, {transform_indices = @transform_6, window_bounds = array<i64: 1, 1, 128>}]} {
    %c0_i32 = arith.constant 0 : i32
    %0 = arith.cmpi eq, %arg1, %c0_i32 : i32
    %1 = arith.extui %0 : i1 to i32
    %c0_i32_0 = arith.constant 0 : i32
    %2 = arith.cmpi ne, %1, %c0_i32_0 : i32
    scf.if %2 {
      %cst_35 = arith.constant 0xFF800000 : f32
      %66 = vector.broadcast %cst_35 : f32 to vector<1x1xf32>
      %c0_36 = arith.constant 0 : index
      %c0_37 = arith.constant 0 : index
      %67 = vector.load %arg9[%c0_36, %c0_37] : memref<1x1xf32, #tpu.memory_space<vmem>>, vector<1x1xf32>
      tpu.vector_store %arg9[%c0_36, %c0_37], %66 {strides = array<i32>} : memref<1x1xf32, #tpu.memory_space<vmem>>, vector<1x1xf32>,
      %cst_38 = arith.constant 0.000000e+00 : f32
      %68 = vector.broadcast %cst_38 : f32 to vector<1x1xf32>
      %c0_39 = arith.constant 0 : index
      %c0_40 = arith.constant 0 : index
      %69 = vector.load %arg10[%c0_39, %c0_40] : memref<1x1xf32, #tpu.memory_space<vmem>>, vector<1x1xf32>
      tpu.vector_store %arg10[%c0_39, %c0_40], %68 {strides = array<i32>} : memref<1x1xf32, #tpu.memory_space<vmem>>, vector<1x1xf32>,
      %cst_41 = arith.constant 0.000000e+00 : f32
      %70 = vector.broadcast %cst_41 : f32 to vector<1x128xf32>
      %c0_42 = arith.constant 0 : index
      %c0_43 = arith.constant 0 : index
      %71 = vector.load %arg11[%c0_42, %c0_43] : memref<1x128xf32, #tpu.memory_space<vmem>>, vector<1x128xf32>
      tpu.vector_store %arg11[%c0_42, %c0_43], %70 {strides = array<i32>} : memref<1x128xf32, #tpu.memory_space<vmem>>, vector<1x128xf32>,
    } else {
    }
    %c0 = arith.constant 0 : index
    %c0_1 = arith.constant 0 : index
    %c0_2 = arith.constant 0 : index
    %3 = vector.load %arg2[%c0, %c0_1, %c0_2] : memref<1x8x128xbf16, #tpu.memory_space<vmem>>, vector<1x8x128xbf16>
    %4 = vector.shape_cast %3 : vector<1x8x128xbf16> to vector<8x128xbf16>
    %c0_3 = arith.constant 0 : index
    %c0_4 = arith.constant 0 : index
    %5 = vector.load %arg3[%c0_3, %c0_4] : memref<128x128xbf16, #tpu.memory_space<vmem>>, vector<128x128xbf16>
    %cst = arith.constant dense<0.000000e+00> : vector<8x128xf32>
    %6 = tpu.matmul %4, %5, %cst {dimension_numbers = #tpu.dot_dimension_numbers<[1], [0], [0], [1], [0, 0, 1, 1], [], []>} : vector<8x128xbf16>, vector<128x128xbf16>, vector<8x128xf32> -> vector<8x128xf32>
    %cst_5 = arith.constant 0.000000e+00 : f32
    %7 = vector.broadcast %cst_5 : f32 to vector<8x128xf32>
    %8 = arith.maximumf %6, %7 : vector<8x128xf32>
    %9 = arith.truncf %8 : vector<8x128xf32> to vector<8x128xbf16>
    %c0_6 = arith.constant 0 : index
    %c0_7 = arith.constant 0 : index
    %10 = vector.load %arg4[%c0_6, %c0_7] : memref<128x256xbf16, #tpu.memory_space<vmem>>, vector<128x256xbf16>
    %cst_8 = arith.constant dense<0.000000e+00> : vector<8x256xf32>
    %11 = tpu.matmul %9, %10, %cst_8 {dimension_numbers = #tpu.dot_dimension_numbers<[1], [0], [0], [1], [0, 0, 1, 1], [], []>} : vector<8x128xbf16>, vector<128x256xbf16>, vector<8x256xf32> -> vector<8x256xf32>
    %c0_9 = arith.constant 0 : index
    %c0_10 = arith.constant 0 : index
    %12 = vector.load %arg5[%c0_9, %c0_10] : memref<1x256xf32, #tpu.memory_space<vmem>>, vector<1x256xf32>
    %13 = vector.broadcast %12 : vector<1x256xf32> to vector<8x256xf32>
    %14 = arith.addf %11, %13 : vector<8x256xf32>
    %15 = vector.extract_strided_slice %14 {offsets = [0, 0], sizes = [8, 128], strides = [1, 1]} : vector<8x256xf32> to vector<8x128xf32>
    %16 = math.tanh %15 : vector<8x128xf32>
    %17 = vector.extract_strided_slice %14 {offsets = [0, 128], sizes = [8, 128], strides = [1, 1]} : vector<8x256xf32> to vector<8x128xf32>
    %18 = arith.negf %17 : vector<8x128xf32>
    %19 = math.exp %18 : vector<8x128xf32>
    %cst_11 = arith.constant 1.000000e+00 : f32
    %20 = vector.broadcast %cst_11 : f32 to vector<8x128xf32>
    %21 = arith.addf %20, %19 : vector<8x128xf32>
    %22 = arith.divf %20, %21 : vector<8x128xf32>
    %23 = arith.mulf %16, %22 : vector<8x128xf32>
    %c0_12 = arith.constant 0 : index
    %c0_13 = arith.constant 0 : index
    %24 = vector.load %arg6[%c0_12, %c0_13] : memref<1x128xf32, #tpu.memory_space<vmem>>, vector<1x128xf32>
    %25 = vector.broadcast %24 : vector<1x128xf32> to vector<8x128xf32>
    %26 = arith.mulf %23, %25 : vector<8x128xf32>
    %cst_14 = arith.constant dense<0.000000e+00> : vector<8xf32>
    %27 = vector.multi_reduction <add>, %26, %cst_14 [1] : vector<8x128xf32> to vector<8xf32>
    %28 = vector.shape_cast %27 : vector<8xf32> to vector<8x1xf32>
    %c0_15 = arith.constant 0 : index
    %c0_16 = arith.constant 0 : index
    %29 = memref.load %arg7[%c0_15, %c0_16] : memref<1x1xf32, #tpu.memory_space<smem>>
    %30 = vector.broadcast %29 : f32 to vector<8x1xf32>
    %31 = arith.addf %28, %30 : vector<8x1xf32>
    %c8_i32 = arith.constant 8 : i32
    %32 = arith.muli %arg1, %c8_i32 : i32
    %33 = tpu.iota {dimensions = array<i32: 0>} : vector<8x1xi32>
    %34 = vector.broadcast %32 : i32 to vector<8x1xi32>
    %35 = arith.addi %34, %33 : vector<8x1xi32>
    %c4_i32 = arith.constant 4 : i32
    %36 = vector.broadcast %c4_i32 : i32 to vector<8x1xi32>
    %37 = arith.cmpi slt, %35, %36 : vector<8x1xi32>
    %cst_17 = arith.constant 0xFF800000 : f32
    %38 = vector.broadcast %cst_17 : f32 to vector<8x1xf32>
    %39 = arith.select %37, %31, %38 : vector<8x1xi1>, vector<8x1xf32>
    %c0_18 = arith.constant 0 : index
    %c0_19 = arith.constant 0 : index
    %40 = vector.load %arg9[%c0_18, %c0_19] : memref<1x1xf32, #tpu.memory_space<vmem>>, vector<1x1xf32>
    %cst_20 = arith.constant dense<0xFF800000> : vector<1xf32>
    %41 = vector.multi_reduction <maximumf>, %39, %cst_20 [0] : vector<8x1xf32> to vector<1xf32>
    %42 = vector.shape_cast %41 : vector<1xf32> to vector<1x1xf32>
    %43 = arith.maximumf %40, %42 : vector<1x1xf32>
    %44 = arith.subf %40, %43 : vector<1x1xf32>
    %45 = math.exp %44 : vector<1x1xf32>
    %46 = vector.broadcast %43 : vector<1x1xf32> to vector<8x1xf32>
    %47 = arith.subf %39, %46 : vector<8x1xf32>
    %48 = math.exp %47 : vector<8x1xf32>
    %c0_21 = arith.constant 0 : index
    %c0_22 = arith.constant 0 : index
    %49 = vector.load %arg10[%c0_21, %c0_22] : memref<1x1xf32, #tpu.memory_space<vmem>>, vector<1x1xf32>
    %50 = arith.mulf %45, %49 : vector<1x1xf32>
    %cst_23 = arith.constant dense<0.000000e+00> : vector<1xf32>
    %51 = vector.multi_reduction <add>, %48, %cst_23 [0] : vector<8x1xf32> to vector<1xf32>
    %52 = vector.shape_cast %51 : vector<1xf32> to vector<1x1xf32>
    %53 = arith.addf %50, %52 : vector<1x1xf32>
    %c0_24 = arith.constant 0 : index
    %c0_25 = arith.constant 0 : index
    %54 = vector.load %arg10[%c0_24, %c0_25] : memref<1x1xf32, #tpu.memory_space<vmem>>, vector<1x1xf32>
    tpu.vector_store %arg10[%c0_24, %c0_25], %53 {strides = array<i32>} : memref<1x1xf32, #tpu.memory_space<vmem>>, vector<1x1xf32>,
    %55 = arith.truncf %48 : vector<8x1xf32> to vector<8x1xbf16>
    %cst_26 = arith.constant dense<0.000000e+00> : vector<1x128xf32>
    %56 = tpu.matmul %55, %9, %cst_26 {dimension_numbers = #tpu.dot_dimension_numbers<[0], [0], [1], [1], [0, 1, 1, 1], [], []>} : vector<8x1xbf16>, vector<8x128xbf16>, vector<1x128xf32> -> vector<1x128xf32>
    %c0_27 = arith.constant 0 : index
    %c0_28 = arith.constant 0 : index
    %57 = vector.load %arg11[%c0_27, %c0_28] : memref<1x128xf32, #tpu.memory_space<vmem>>, vector<1x128xf32>
    %58 = vector.broadcast %45 : vector<1x1xf32> to vector<1x128xf32>
    %59 = arith.mulf %58, %57 : vector<1x128xf32>
    %60 = arith.addf %59, %56 : vector<1x128xf32>
    %c0_29 = arith.constant 0 : index
    %c0_30 = arith.constant 0 : index
    %61 = vector.load %arg11[%c0_29, %c0_30] : memref<1x128xf32, #tpu.memory_space<vmem>>, vector<1x128xf32>
    tpu.vector_store %arg11[%c0_29, %c0_30], %60 {strides = array<i32>} : memref<1x128xf32, #tpu.memory_space<vmem>>, vector<1x128xf32>,
    %c0_31 = arith.constant 0 : index
    %c0_32 = arith.constant 0 : index
    %62 = vector.load %arg9[%c0_31, %c0_32] : memref<1x1xf32, #tpu.memory_space<vmem>>, vector<1x1xf32>
    tpu.vector_store %arg9[%c0_31, %c0_32], %43 {strides = array<i32>} : memref<1x1xf32, #tpu.memory_space<vmem>>, vector<1x1xf32>,
    %c0_i32_33 = arith.constant 0 : i32
    %63 = arith.cmpi eq, %arg1, %c0_i32_33 : i32
    %64 = arith.extui %63 : i1 to i32
    %c0_i32_34 = arith.constant 0 : i32
    %65 = arith.cmpi ne, %64, %c0_i32_34 : i32
    scf.if %65 {
      %c0_35 = arith.constant 0 : index
      %c0_36 = arith.constant 0 : index
      %66 = vector.load %arg11[%c0_35, %c0_36] : memref<1x128xf32, #tpu.memory_space<vmem>>, vector<1x128xf32>
      %c0_37 = arith.constant 0 : index
      %c0_38 = arith.constant 0 : index
      %67 = vector.load %arg10[%c0_37, %c0_38] : memref<1x1xf32, #tpu.memory_space<vmem>>, vector<1x1xf32>
      %68 = tpu.reciprocal %67 {approx = true} : vector<1x1xf32> -> vector<1x1xf32>
      %69 = vector.broadcast %68 : vector<1x1xf32> to vector<1x128xf32>
      %70 = arith.mulf %66, %69 : vector<1x128xf32>
      %c0_39 = arith.constant 0 : index
      %c0_40 = arith.constant 0 : index
      %c0_41 = arith.constant 0 : index
      %71 = vector.load %arg8[%c0_39, %c0_40, %c0_41] : memref<1x1x128xf32, #tpu.memory_space<vmem>>, vector<1x1x128xf32>
      %72 = vector.shape_cast %71 : vector<1x1x128xf32> to vector<1x128xf32>
      %73 = vector.shape_cast %70 : vector<1x128xf32> to vector<1x1x128xf32>
      tpu.vector_store %arg8[%c0_39, %c0_40, %c0_41], %73 {strides = array<i32>} : memref<1x1x128xf32, #tpu.memory_space<vmem>>, vector<1x1x128xf32>,
    } else {
    }
    return
  }
  func.func @transform_0(%arg0: i32, %arg1: i32) -> (i32, i32, i32) {
    %c0_i32 = arith.constant 0 : i32
    %c0_i32_0 = arith.constant 0 : i32
    return %arg0, %arg1, %c0_i32 : i32, i32, i32
  }
  func.func @transform_1(%arg0: i32, %arg1: i32) -> (i32, i32) {
    %c0_i32 = arith.constant 0 : i32
    %c0_i32_0 = arith.constant 0 : i32
    %c0_i32_1 = arith.constant 0 : i32
    return %c0_i32, %c0_i32_0 : i32, i32
  }
  func.func @transform_2(%arg0: i32, %arg1: i32) -> (i32, i32) {
    %c0_i32 = arith.constant 0 : i32
    %c0_i32_0 = arith.constant 0 : i32
    %c0_i32_1 = arith.constant 0 : i32
    return %c0_i32, %c0_i32_0 : i32, i32
  }
  func.func @transform_3(%arg0: i32, %arg1: i32) -> (i32, i32) {
    %c0_i32 = arith.constant 0 : i32
    %c0_i32_0 = arith.constant 0 : i32
    %c0_i32_1 = arith.constant 0 : i32
    return %c0_i32, %c0_i32_0 : i32, i32
  }
  func.func @transform_4(%arg0: i32, %arg1: i32) -> (i32, i32) {
    %c0_i32 = arith.constant 0 : i32
    %c0_i32_0 = arith.constant 0 : i32
    %c0_i32_1 = arith.constant 0 : i32
    return %c0_i32, %c0_i32_0 : i32, i32
  }
  func.func @transform_5(%arg0: i32, %arg1: i32) -> (i32, i32) {
    %c0_i32 = arith.constant 0 : i32
    %c0_i32_0 = arith.constant 0 : i32
    %c0_i32_1 = arith.constant 0 : i32
    return %c0_i32, %c0_i32_0 : i32, i32
  }
  func.func @transform_6(%arg0: i32, %arg1: i32) -> (i32, i32, i32) {
    %c0_i32 = arith.constant 0 : i32
    %c0_i32_0 = arith.constant 0 : i32
    %c0_i32_1 = arith.constant 0 : i32
    return %arg0, %c0_i32, %c0_i32_0 : i32, i32, i32
  }
}

</mosaic_0001>

<bundles_post_ra>
// kernel: tpu_custom_call.1
= control target key start
LH: loop header
LB: loop body
LE: loop exit
PB: predicated region body
PF: predicated region fallthrough
CT: control target
= control target key end

     0   :  { %6 = vsyncpa [#allocation3], 0  ;;  %s103_s0 = inlined_call_operand.hbm [shape: f32[8,128], index: 0, kind: input, shape index: {}]   ;;  %s104_s1 = inlined_call_operand.hbm [shape: f32[8,128], index: 1, kind: output, shape index: {}]  }
   0x1   :  { %7 = vsyncpa [#allocation4], 0  ;;  %s85_s6 = smov [#allocation2]  }
   0x2   :  { %s14_s7 = sshll.u32 %s85_s6, 4  ;;  %s15_s7 = int_to_ptr.vmem [resolvable:$true] %s14_s7 }
   0x3   :  { %s49_s8 = scalar_lea.vmem %s15_s7, 128  ;;  %p54_p1 = scmp.lt.s32.totalorder %s15_s7, %s15_s7 }
   0x4   :  { %p50_p0 = scmp.ne.s32.totalorder %s15_s7, %s49_s8  ;;  %p55_p2 = scmp.lt.s32.totalorder %s49_s8, %s49_s8 }
   0x6   :  { %p56_p3 = por %p55_p2, %p54_p1 }
   0x8   :  { %p57_p4 = pnand %p56_p3, %p50_p0 }
   0xa   :  { %60 = shalt.err (!%p57_p4)
}
   0xb   :  { %17 = dma.hbm_to_vmem [thread:$0]  %s103_s0, 128, %s15_s7, [#allocation3]  }
   0xc   :  { %81 = dma.done.wait [#allocation3], 128  }
   0xd   :  { %82 = vsyncadd [#allocation3], 4294967168  ;;  %s86_s11 = smov [#allocation5]   ;;  %v21_v0 = vld [vmem:[#allocation2] sm:$0xff] }
   0xe   :  { %s30_s12 = sshll.u32 %s86_s11, 4  ;;  %v22_v1 = vadd.f32 1.0, %v21_v0  ;;  %s31_s12 = int_to_ptr.vmem [resolvable:$true] %s30_s12 }
   0xf   :  { %s61_s13 = scalar_lea.vmem %s31_s12, 128  ;;  %p66_p6 = scmp.lt.s32.totalorder %s31_s12, %s31_s12 }
  0x10   :  { %23 = vst [vmem:[#allocation5] sm:$0xff] %v22_v1  ;;  %p62_p5 = scmp.ne.s32.totalorder %s31_s12, %s61_s13  ;;  %p67_p7 = scmp.lt.s32.totalorder %s61_s13, %s61_s13 }
  0x12   :  { %p68_p8 = por %p67_p7, %p66_p6 }
  0x14   :  { %p69_p9 = pnand %p68_p8, %p62_p5 }
  0x16   :  { %72 = shalt.err (!%p69_p9)
}
  0x17   :  { %33 = dma.vmem_to_hbm [thread:$0]  %s31_s12, 128, %s104_s1, [#allocation4]  }
  0x18   :  { %83 = dma.done.wait [#allocation4], 128  }
  0x19   :  { %84 = vsyncadd [#allocation4], 4294967168 }
  0x1a   :  { %37 = vsyncpa [#allocation3], 1 }
  0x1b   :  { %38 = vsyncpa [#allocation4], 1 }

// kernel: tpu_custom_call.1
= control target key start
LH: loop header
LB: loop body
LE: loop exit
PB: predicated region body
PF: predicated region fallthrough
CT: control target
= control target key end

     0   :  { %s1484_s0 = inlined_call_operand.hbm [shape: bf16[2,8,128], index: 0, kind: input, shape index: {}]   ;;  %s1485_s1 = inlined_call_operand.hbm [shape: bf16[128,128], index: 1, kind: input, shape index: {}]   ;;  %s1486_s2 = inlined_call_operand.hbm [shape: bf16[128,256], index: 2, kind: input, shape index: {}]   ;;  %s1487_s3 = inlined_call_operand.vmem [shape: f32[1,256], index: 3, kind: input, shape index: {}]   ;;  %s1488_s4 = inlined_call_operand.vmem [shape: f32[1,128], index: 4, kind: input, shape index: {}]   ;;  %s1489_s5 = inlined_call_operand.<no memory space> [shape: f32[1,1], index: 5, kind: input, shape index: {}]   ;;  %s1490_s6 = inlined_call_operand.hbm [shape: f32[2,1,128], index: 6, kind: output, shape index: {}]  }
   0x1   :  { %1494 = sst [smem:[#allocation16_spill]] %s1485_s1 }
   0x2   :  { %11 = sst [smem:[#allocation5]] %s1489_s5 }
   0x3   :  { %12 = vsyncpa [#allocation7], 0 }
   0x4   :  { %14 = vsyncpa [#allocation7 + $0x1], 0 }
   0x5   :  { %15 = vsyncpa [#allocation10], 0 }
   0x6   :  { %16 = vsyncpa [#allocation8], 0 }
   0x7   :  { %18 = vsyncpa [#allocation8 + $0x1], 0  ;;  %s1272_s23 = smov 0   ;;  %s1274_s24 = smov 0  }
   0x8   :  { %s1276_s25 = smov 0   ;;  %s1278_s26 = smov 0  }
   0x9   :  { %s1280_s27 = smov 0   ;;  %s1282_s28 = smov 0  }
   0xa LB: > { %s840_s5 = sadd.s32 4294967295, %s1220_s28   ;;  %s841_s29 = sadd.s32 4294967294, %s1220_s28   ;;  %s1220_s28 = sphi %s1282_s28, %s24_s28   ;;  %s1216_s27 = sphi %s1280_s27, %s1512_s27   ;;  %s1212_s26 = sphi %s1278_s26, %s1511_s26   ;;  %s1208_s25 = sphi %s1276_s25, %s1510_s25   ;;  %s1204_s24 = sphi %s1274_s24, %s1509_s24   ;;  %s1200_s23 = sphi %s1272_s23, %s1508_s23  }
   0xb   : > { %p58_p0 = scmp.ne.s32.totalorder %s1204_s24, %s1200_s23  ;;  %p1306_p1 = scmp.eq.s32.totalorder %s840_s5, 0 }
   0xc   : > { %p1310_p2 = scmp.eq.s32.totalorder %s840_s5, 1  ;;  %p193_p3 = scmp.eq.s32.totalorder %s841_s29, 1 }
   0xd   : > { %s1495_s30 = scalar_select %p1306_p1, 1, 0 }
   0xe   : > { %p1316_p4 = por %p1306_p1, %p58_p0  ;;  %p842_p5 = scmp.ge.s32.totalorder %s1220_s28, 1 }
   0xf   : > { %p1321_p6 = por %p193_p3, %p58_p0  ;;  %p200_p7 = scmp.lt.s32.totalorder %s1220_s28, 3 }
  0x10   : > { %s1497_s8 = scalar_select %p1316_p4, 1, 0 }
  0x11   : > { %s1498_s9 = scalar_select %p1321_p6, 1, 0 }
  0x12   : > { %p1326_p8 = pnand %p842_p5, %p200_p7  ;;  %s1222_s11 = smov [#allocation9]  }
  0x13   : > { %s212_s12 = sshll.u32 %s1222_s11, 4  ;;  %s1223_s14 = smov [#allocation11]   ;;  %s213_s12 = int_to_ptr.vmem [resolvable:$true] %s212_s12 }
  0x14   : > { %p931_p9 = pneg %p1326_p8  ;;  %s225_s15 = sshll.u32 %s1223_s14, 4  ;;  %s226_s15 = int_to_ptr.vmem [resolvable:$true] %s225_s15 }
  0x15   : > { %s1067_s16 = scalar_lea.vmem %s213_s12, 1024  ;;  %p1075_p5 = scmp.lt.s32.totalorder %s213_s12, %s213_s12 }
  0x16   : > { %p1335_p11 = pnand %p931_p9, %p1306_p1  ;;  %p1068_p13 = scmp.ne.s32.totalorder %s213_s12, %s1067_s16 }
  0x17   : > { %p1076_p7 = scmp.lt.s32.totalorder %s1067_s16, %s1067_s16 }
  0x18   : > { %p1058_p12 = pneg %p1335_p11 }
  0x19   : > { %p1077_p10 = por %p1076_p7, %p1075_p5 }
  0x1a   : > { %p1070_p0 = pnand %p1068_p13, %p1058_p12 }
  0x1c   : > { %p1071_p3 = pneg %p1070_p0 }
  0x1e   : > { %p1078_p9 = pnand %p1077_p10, %p1071_p3 }
  0x20   : > { %1081 = shalt.err (!%p1078_p9)
}
  0x21   : > { %s1224_s17 = smov 64   ;;  %s1225_s18 = smov 4  }
  0x22   : > { %s1501_s1 = sld [smem:[#allocation16_spill]]  ;;  %s1093_s21 = scalar_lea.vmem %s226_s15, 2048 }
  0x23   : > { %p1094_p6 = scmp.ne.s32.totalorder %s226_s15, %s1093_s21  ;;  %p1101_p1 = scmp.lt.s32.totalorder %s226_s15, %s226_s15 }
  0x24   : > { %p1102_p4 = scmp.lt.s32.totalorder %s1093_s21, %s1093_s21 }
  0x25   : > { %p1096_p13 = pnand %p1094_p6, %p1058_p12 }
  0x26   : > { %p1103_p5 = por %p1102_p4, %p1101_p1 }
  0x27   : > { %p1097_p0 = pneg %p1096_p13 }
  0x28   : > { %934 = dma.hbm_to_vmem [thread:$0]  (!%p1335_p11), %s1501_s1, 1024, %s213_s12, [#allocation10], %s1224_s17, %s1224_s17, %s1225_s18  }
  0x29   : > { %p1104_p10 = pnand %p1103_p5, %p1097_p0 }
  0x2b   : > { %1107 = shalt.err (!%p1104_p10)
}
  0x2c   : > { %s1226_s22 = smov 128   ;;  %s1227_s5 = smov 8  }
  0x2d   : > { %937 = dma.hbm_to_vmem [thread:$0]  (!%p1335_p11), %s1486_s2, 2048, %s226_s15, [#allocation10], %s1226_s22, %s1226_s22, %s1227_s5  }
  0x2e   : > { %s36_s12 = sadd.s32 1, %s1216_s27  ;;  %s45_s14 = sadd.s32 1, %s1208_s25 }
  0x2f   : > { %p38_p1 = scmp.ge.s32.totalorder %s36_s12, 2  ;;  %p52_p4 = scmp.ne.s32.totalorder %s1208_s25, %s1204_s24 }
  0x30   : > { %p53_p6 = scmp.eq.s32.totalorder %s1220_s28, 0  ;;  %p948_p12 = scmp.lt.s32.totalorder %s1220_s28, 2 }
  0x31   : > { %s1514_s12 = smov (%p38_p1, %s36_s12), 0  ;;  %p1367_p7 = por %p1310_p2, %p52_p4 }
  0x32   : > { %p54_p3 = por %p53_p6, %p52_p4  ;;  %s40_s13 = ssub.s32 %s1216_s27, %s1514_s12 }
  0x33   : > { %s248_s17 = sand.u32 1, %s1208_s25   ;;  %p43_p9 = scmp.eq.s32.totalorder %s40_s13, 0 }
  0x34   : > { %s846_s15 = sshll.u32 %s248_s17, 2  ;;  %s847_s18 = sshll.u32 %s1216_s27, 6 }
  0x35   : > { %s1376_s19 = scalar_select %p43_p9, %s1208_s25, %s45_s14  }
  0x36   : > { %s258_s22 = scalar_lea.hbm %s1484_s0, %s847_s18  ;;  %s252_s5 = scalar_lea.vmem [#allocation6], %s846_s15 }
  0x37   : > { %s260_s29 = sshll.u32 %s252_s5, 4  ;;  %p1383_p11 = pnand %p948_p12, %p54_p3  ;;  %s261_s29 = int_to_ptr.vmem [resolvable:$true] %s260_s29 }
  0x38   : > { %s249_s11 = scalar_lea.sflag [#allocation7], %s248_s17  ;;  %s1121_s13 = scalar_lea.vmem %s261_s29, 64 }
  0x39   : > { %p1110_p2 = pneg %p1383_p11  ;;  %p1122_p13 = scmp.ne.s32.totalorder %s261_s29, %s1121_s13 }
  0x3a   : > { %s1228_s14 = smov [#allocation6]  }
  0x3b   : > { %p1124_p0 = pnand %p1122_p13, %p1110_p2  ;;  %s1126_s1 = sshll.u32 %s1228_s14, 4  ;;  %s1127_s1 = int_to_ptr.vmem [resolvable:$false] %s1126_s1 }
  0x3c   : > { %s1128_s18 = scalar_lea.vmem %s1127_s1, 128  ;;  %p1129_p10 = scmp.lt.s32.totalorder %s261_s29, %s1127_s1 }
  0x3d   : > { %p1125_p5 = pneg %p1124_p0  ;;  %p1130_p1 = scmp.lt.s32.totalorder %s1128_s18, %s1121_s13 }
  0x3f   : > { %p1131_p4 = por %p1130_p1, %p1129_p10 }
  0x41   : > { %p1132_p6 = pnand %p1131_p4, %p1125_p5 }
  0x43   : > { %1135 = shalt.err (!%p1132_p6)
}
  0x44   : > { %941 = dma.hbm_to_vmem [thread:$0]  (!%p1383_p11), %s258_s22, 64, %s261_s29, %s249_s11  }
  0x45   : > { %269 = sbr.rel (%p1326_p8) target bundleno = 1035 (0x40b), region = 44  ;;  %s1394_s17 = sand.u32 (!%p1326_p8), 1, %s1204_s24  }
  0x46   : > { %s849_s15 = sshll.u32 (!%p1326_p8), %s1394_s17, 2  ;;  %s272_s20 = scalar_lea.sflag (!%p1326_p8), [#allocation7], %s1394_s17 }
  0x47   : > { %s1398_s21 = scalar_lea.vmem (!%p1326_p8), [#allocation6], %s849_s15  ;;  %p1504_p12 = scmp.ne.s32.totalorder (!%p1326_p8), %s1497_s8, 0 }
  0x4a   : > { %1187 = dma.done.wait (%p1504_p12), %s272_s20, 64  }
  0x4b   : > { %1189 = vsyncadd (%p1504_p12), %s272_s20, 4294967232  ;;  %p1505_p3 = scmp.ne.s32.totalorder %s1495_s30, 0 }
  0x4d   : > { %1191 = dma.done.wait (%p1505_p3), [#allocation10], 3072  }
  0x4e   : > { %1193 = vsyncadd (%p1505_p3), [#allocation10], 4294964224  ;;  %v1229_v0 = vmov 0.0   ;;  %vm1230_vm0 = vmmov 0   ;;  %v1012_v1 = vld [vmem:[#allocation9 + $0x38] sm:$0xff]   ;;  %v1013_v2 = vld [vmem:[#allocation9 + $0x30] sm:$0xff]   ;;  %v445_v35 = vlaneseq }
  0x4f   : > { %893 = vmatprep.subr.bf16.mxu0 %v1229_v0  ;;  %319 = vst [vmem:[#allocation4] sm:$0x1] %v1229_v0  ;;  %909 = vmatprep.mubr.msk.bf16.mxu0 %vm1230_vm0, %v1229_v0  ;;  %v1014_v3 = vld [vmem:[#allocation9 + $0x28] sm:$0xff]   ;;  %v1020_v4 = vld [vmem:[#allocation11 + $0x74] ss:$8 sps:$4 sm:$0xff]   ;;  %v1015_v6 = vld [vmem:[#allocation9 + $0x20] sm:$0xff]  }
  0x50   : > { %894 = vmatpush3.bf16.msra.mxu0 %v1012_v1  ;;  %v1022_v5 = vld [vmem:[#allocation11 + $0x70] ss:$8 sps:$4 sm:$0xff]   ;;  %v1023_v7 = vld [vmem:[#allocation11 + $0x64] ss:$8 sps:$4 sm:$0xff]   ;;  %535 = vmatprep.subr.bf16.mxu1 %v1020_v4  ;;  %v1025_v8 = vld [vmem:[#allocation11 + $0x60] ss:$8 sps:$4 sm:$0xff]  }
  0x51   : > { %895 = vmatprep.subr.bf16.mxu0 %v1229_v0  ;;  %536 = vmatpush1.bf16.msra.mxu1 %v1022_v5  ;;  %v1026_v9 = vld [vmem:[#allocation11 + $0x54] ss:$8 sps:$4 sm:$0xff]   ;;  %v1028_v11 = vld [vmem:[#allocation11 + $0x50] ss:$8 sps:$4 sm:$0xff]   ;;  %v1029_v12 = vld [vmem:[#allocation11 + $0x44] ss:$8 sps:$4 sm:$0xff]  }
  0x52   : > { %537 = vmatprep.subr.bf16.mxu1 %v1023_v7  ;;  %v1016_v10 = vld [vmem:[#allocation9 + $0x18] sm:$0xff]   ;;  %v1017_v13 = vld [vmem:[#allocation9 + $0x10] sm:$0xff]   ;;  %v1031_v14 = vld [vmem:[#allocation11 + $0x40] ss:$8 sps:$4 sm:$0xff]   ;;  %v1231_v26 = vmov 0   ;;  %vm658_vm1 = vcmask 1043456  }
  0x53   : > { %v1032_v15 = vld [vmem:[#allocation11 + $0x34] ss:$8 sps:$4 sm:$0xff]   ;;  %v1018_v16 = vld [vmem:[#allocation9 + $0x8] sm:$0xff]   ;;  %v1034_v17 = vld [vmem:[#allocation11 + $0x30] ss:$8 sps:$4 sm:$0xff]   ;;  %567 = vmatprep.mubr.bf16.mxu1 %v1231_v26  ;;  %1010 = vset.pattern.permute.xlu1 %v1231_v26  ;;  %vm316_vm2 = vcmask 0  }
  0x54   : > { %896 = vmatpush3.bf16.msra.mxu0 %v1013_v2  ;;  %v1035_v18 = vld [vmem:[#allocation11 + $0x24] ss:$8 sps:$4 sm:$0xff]   ;;  %v1037_v20 = vld [vmem:[#allocation11 + $0x20] ss:$8 sps:$4 sm:$0xff]   ;;  %v1038_v21 = vld [vmem:[#allocation11 + $0x14] ss:$8 sps:$4 sm:$0xff]  }
  0x55   : > { %897 = vmatprep.subr.bf16.mxu0 %v1229_v0  ;;  %538 = vmatpush1.bf16.msra.mxu1 %v1025_v8  ;;  %v1019_v19 = vld [vmem:[#allocation9] sm:$0xff]   ;;  %v320_v22 = vld [vmem:[%s1398_s21] sm:$0xf]  ;;  %v1232_v34 = vmov -inf   ;;  %318 = vst.msk [vmem:[#allocation3] sm:$0x1] %vm316_vm2, %v1229_v0 }
  0x56   : > { %539 = vmatprep.subr.bf16.mxu1 %v1026_v9  ;;  %v1040_v23 = vld [vmem:[#allocation11 + $0x10] ss:$8 sps:$4 sm:$0xff]   ;;  %v1041_v24 = vld [vmem:[#allocation11 + $0x4] ss:$8 sps:$4 sm:$0xff]   ;;  %v1043_v25 = vld [vmem:[#allocation11] ss:$8 sps:$4 sm:$0xff]  }
  0x57   : > { %317 = vst.msk [vmem:[#allocation2] sm:$0x1] %vm316_vm2, %v1232_v34  ;;  %v446_v36 = vshrl.u32 %v445_v35, 7  ;;  %v443_v38 = vld [vmem:[%s1487_s3] sm:$0x3]  ;;  %s594_s22 = sld [smem:[#allocation5]] }
  0x58   : > { %898 = vmatpush3.bf16.msra.mxu0 %v1014_v3  ;;  %v877_v53 = vld [vmem:[%s1488_s4] ss:$0 sm:$0xff]  ;;  %vm626_vm4 = vcmask 7168   ;;  %vm654_vm5 = vcmask 64512   ;;  %s879_s5 = sshll.u32 %s1212_s26, 4  ;;  %s310_s29 = scalar_lea.vmem [#allocation12], %s1394_s17 }
  0x59   : > { %899 = vmatprep.subr.bf16.mxu0 %v1229_v0  ;;  %540 = vmatpush1.bf16.msra.mxu1 %v1028_v11  ;;  %v451_v37 = vsub.s32 1, %v446_v36  ;;  %v1431_v46 = vsub.s32 0, %v446_v36  ;;  %vm602_vm3 = vcmp.lt.s32.totalorder %v446_v36, 4  ;;  %s746_s7 = sshll.u32 %s310_s29, 4  ;;  %s744_s14 = scalar_lea.hbm %s1490_s6, %s879_s5  ;;  %s747_s7 = int_to_ptr.vmem [resolvable:$true] %s746_s7 }
  0x5a   : > { %541 = vmatprep.subr.bf16.mxu1 %v1029_v12  ;;  %s734_s18 = scalar_lea.sflag [#allocation8], %s1394_s17  ;;  %s1136_s15 = scalar_lea.vmem %s747_s7, 16 }
  0x5b   : > { %v452_v39 = vrot.slane %v443_v38, %v451_v37  ;;  %v448_v47 = vrot.slane %v443_v38, %v1431_v46  ;;  %p1137_p8 = scmp.ne.s32.totalorder %s747_s7, %s1136_s15  ;;  %s1233_s20 = smov [#allocation12]  }
  0x5c   : > { %900 = vmatpush3.bf16.msra.mxu0 %v1015_v6  ;;  %s1140_s26 = sshll.u32 %s1233_s20, 4  ;;  %s1141_s26 = int_to_ptr.vmem [resolvable:$false] %s1140_s26 }
  0x5d   : > { %901 = vmatprep.subr.bf16.mxu0 %v1229_v0  ;;  %542 = vmatpush1.bf16.msra.mxu1 %v1031_v14  ;;  %v595_v56 = vstv %s594_s22  ;;  %p1138_p9 = pnand %p1137_p8, %p1367_p7  ;;  %s1142_s21 = scalar_lea.vmem %s1141_s26, 32 }
  0x5e   : > { %543 = vmatprep.subr.bf16.mxu1 %v1032_v15  ;;  %v604_v1 = vld [vmem:[#allocation2] sm:$0x1]  ;;  %p1143_p2 = scmp.lt.s32.totalorder %s747_s7, %s1141_s26  ;;  %p1144_p13 = scmp.lt.s32.totalorder %s1142_s21, %s1136_s15 }
  0x5f   : > { %p1139_p11 = pneg %p1138_p9 }
  0x60   : > { %902 = vmatpush3.bf16.msra.mxu0 %v1016_v10  ;;  %p1145_p0 = por %p1144_p13, %p1143_p2 }
  0x61   : > { %903 = vmatprep.subr.bf16.mxu0 %v1229_v0  ;;  %544 = vmatpush1.bf16.msra.mxu1 %v1034_v17  ;;  %v624_v17 = vld [vmem:[#allocation3] sm:$0x1] }
  0x62   : > { %545 = vmatprep.subr.bf16.mxu1 %v1035_v18  ;;  %p1146_p5 = pnand %p1145_p0, %p1139_p11 }
  0x64   : > { %904 = vmatpush3.bf16.msra.mxu0 %v1017_v13 }
  0x65   : > { %905 = vmatprep.subr.bf16.mxu0 %v1229_v0  ;;  %546 = vmatpush1.bf16.msra.mxu1 %v1037_v20 }
  0x66   : > { %547 = vmatprep.subr.bf16.mxu1 %v1038_v21 }
  0x68   : > { %906 = vmatpush3.bf16.msra.mxu0 %v1018_v16 }
  0x69   : > { %907 = vmatprep.subr.bf16.mxu0 %v1229_v0  ;;  %548 = vmatpush1.bf16.msra.mxu1 %v1040_v23 }
  0x6a   : > { %549 = vmatprep.subr.bf16.mxu1 %v1041_v24 }
  0x6c   : > { %908 = vmatpush3.bf16.msra.mxu0 %v1019_v19 }
  0x6d   : > { %913 = vmatprep.subr.bf16.mxu0 %v1229_v0  ;;  %550 = vmatpush1.bf16.msra.mxu1 %v1043_v25 }
  0x6f   : > { %910 = vmatmul.mubr.bf16.vlgmr.msra.gmra.mxu0 %v320_v22 }
  0x70   : > { %915 = vmatprep.mubr.msk.bf16.mxu0 %vm1230_vm0, %v1229_v0 }
 0x12f   : > { %v419_v27 = vpop.f32.mrf.mxu0 }
 0x130   : > { %v425_v28 = vmax.f32 %v419_v27, 0.0 }
 0x131   : > { %v911_v29 = vpop.f32.mrf.mxu0 }
 0x132   : > { %v426_v30 = vpack.c.bf16 %v425_v28, %v425_v28  ;;  %v702_v28 = vld [vmem:[#allocation4] sm:$0x1] }
 0x133   : > { %v422_v31 = vpop.f32.mrf.mxu0 }
 0x134   : > { %v660_v32 = vsel %vm658_vm1, %v426_v30, 0  ;;  %568 = vmatmul.mubr.bf16.vlgmr.msra.gmra.mxu1 %v426_v30 }
 0x135   : > { %v912_v33 = vpop.f32.mrf.mxu0  ;;  %914 = vmatpush3.bf16.msra.mxu0 %v660_v32 }
 0x1f4   : > { %v569_v40 = vpop.f32.mrf.mxu1 }
 0x1f5   : > { %v570_v48 = vadd.f32 %v569_v40, %v448_v47 }
 0x1f6   : > { %v571_v41 = vpop.f32.mrf.mxu1 }
 0x1f7   : > { %v572_v42 = vadd.f32 %v571_v41, %v452_v39 }
 0x1f8   : > { %v573_v43 = vpop.f32.mrf.mxu1 }
 0x1f9   : > { %v876_v44 = vmul.f32 -1.442695, %v572_v42 }
 0x1fa   : > { %v574_v45 = vpop.f32.mrf.mxu1 }
 0x1fb   : > { %1044 = vpow2.f32 %v876_v44 }
 0x1fc   : > { %1046 = vtanh.f32 %v570_v48 }
 0x208   : > { %v1045_v49 = vpop.eup %1044 }
 0x209   : > { %v580_v50 = vadd.f32 1.0, %v1045_v49  ;;  %v1047_v51 = vpop.eup %1046 }
 0x20b   : > { %1048 = vrcp.f32 %v580_v50 }
 0x218   : > { %v1049_v52 = vpop.eup %1048 }
 0x219   : > { %v583_v54 = vmul.f32 %v1049_v52, %v1047_v51 }
 0x21b   : > { %v591_v55 = vmul.f32 %v877_v53, %v583_v54 }
 0x21d   : > { %592 = vadd.xlane.f32.xlu0 %v591_v55 }
 0x2a6   : > { %v593_v57 = vpop.xlane.xlu0 %592 }
 0x2a7   : > { %v596_v58 = vadd.f32 %v595_v56, %v593_v57 }
 0x2a9   : > { %v603_v59 = vsel %vm602_vm3, %v596_v58, -inf }
 0x2aa   : > { %v605_v60 = vrot.slane %v603_v59, 4 }
 0x2ac   : > { %v606_v61 = vmax.f32 %v603_v59, %v605_v60 }
 0x2ae   : > { %v607_v62 = vrot.slane %v606_v61, 2 }
 0x2b0   : > { %v608_v63 = vmax.f32 %v606_v61, %v607_v62 }
 0x2b2   : > { %v609_v0 = vrot.slane %v608_v63, 1 }
 0x2b4   : > { %v610_v2 = vmax.f32 %v608_v63, %v609_v0 }
 0x2b6   : > { %v611_v3 = vmax.f32 %v604_v1, %v610_v2 }
 0x2b8   : > { %v619_v4 = vrot.slane %v611_v3, %v1431_v46  ;;  %715 = vst.msk [vmem:[#allocation2] sm:$0x1] %vm316_vm2, %v611_v3  ;;  %v612_v5 = vsub.f32 %v604_v1, %v611_v3 }
 0x2ba   : > { %v621_v6 = vsub.f32 %v603_v59, %v619_v4  ;;  %v613_v7 = vmul.f32 1.442695, %v612_v5 }
 0x2bc   : > { %v622_v8 = vmul.f32 1.442695, %v621_v6  ;;  %1050 = vpow2.f32 %v613_v7 }
 0x2be   : > { %1052 = vpow2.f32 %v622_v8 }
 0x2c9   : > { %v1051_v9 = vpop.eup %1050 }
 0x2ca   : > { %705 = vperm.xlu1 %1010, %v1051_v9   ;;  %v625_v20 = vmul.f32 %v1051_v9, %v624_v17 }
 0x2cb   : > { %v1053_v10 = vpop.eup %1052 }
 0x2cc   : > { %v627_v11 = vsel %vm626_vm4, %v1053_v10, 0.0  ;;  %v637_v12 = vpack.c.bf16 %v1053_v10, %v1053_v10 }
 0x2cd   : > { %v628_v13 = vrot.slane %v627_v11, 4 }
 0x2ce   : > { %638 = vxpose.xlu0.c.b16.start.end [1/1] (short) (narrow) %v637_v12, 16 }
 0x2cf   : > { %v629_v14 = vadd.f32 %v628_v13, %v627_v11 }
 0x2d1   : > { %v630_v15 = vrot.slane %v629_v14, 2 }
 0x2d3   : > { %v631_v16 = vadd.f32 %v630_v15, %v629_v14 }
 0x2d5   : > { %v632_v18 = vrot.slane %v631_v16, 1 }
 0x2d7   : > { %v633_v19 = vadd.f32 %v632_v18, %v631_v16  ;;  %1011 = vset.pattern.permute.xlu0 %v1231_v26 }
 0x2d9   : > { %v634_v21 = vadd.f32 %v633_v19, %v625_v20 }
 0x2db   : > { %636 = vst.msk [vmem:[#allocation3] sm:$0x1] %vm316_vm2, %v634_v21 }
 0x2e2   : > { %v720_v22 = vld [vmem:[#allocation3] sm:$0x1] }
 0x2e3   : > { %1054 = vrcp.f32 %v720_v22 }
 0x2f0   : > { %v1055_v23 = vpop.eup %1054 }
 0x2f1   : > { %724 = vperm.xlu1 %1010, %v1055_v23  }
 0x330   : > { %v646_v24 = vpop.trf.xlu0 }
 0x331   : > { %916 = vmatmul.mubr.msk.bf16.vlgmr.msra.gmra.mxu0 %vm654_vm5, %v646_v24 }
 0x345   : > { %v706_v25 = vpop.permute.xlu1 %705 }
 0x346   : > { %v711_v27 = vrot.slane %v706_v25, %v1431_v46 }
 0x348   : > { %v712_v29 = vmul.f32 %v711_v27, %v702_v28 }
 0x36c   : > { %v725_v33 = vpop.permute.xlu1 %724 }
 0x36d   : > { %v730_v35 = vrot.slane %v725_v33, %v1431_v46 }
 0x3f1   : > { %v696_v30 = vpop.f32.mrf.mxu0 }
 0x3f2   : > { %v713_v26 = vadd.f32 %v712_v29, %v696_v30 }
 0x3f3   : > { %v917_v31 = vpop.f32.mrf.mxu0 }
 0x3f4   : > { %714 = vst [vmem:[#allocation4] sm:$0x1] %v713_v26 }
 0x3f5   : > { %v699_v32 = vpop.f32.mrf.mxu0 }
 0x3f7   : > { %v918_v34 = vpop.f32.mrf.mxu0 }
 0x3fb   : > { %v719_v36 = vld [vmem:[#allocation4] sm:$0x1] }
 0x3fc   : > { %v731_v37 = vmul.f32 %v730_v35, %v719_v36 }
 0x3fe   : > { %732 = vst [vmem:[%s310_s29] sm:$0x1] %v731_v37 }
 0x3ff   : > { %1149 = shalt.err (!%p1146_p5)
}
 0x400   : > { %s1150_s1 = scalar_lea.hbm %s744_s14, 16  ;;  %s1154_s8 = scalar_lea.hbm %s1490_s6, 32 }
 0x401   : > { %p1151_p10 = scmp.ne.s32.totalorder %s744_s14, %s1150_s1  ;;  %p1155_p6 = scmp.lt.s32.totalorder %s744_s14, %s1490_s6 }
 0x402   : > { %p1156_p12 = scmp.lt.s32.totalorder %s1154_s8, %s1150_s1 }
 0x403   : > { %p1152_p1 = pnand %p1151_p10, %p1367_p7 }
 0x404   : > { %p1157_p3 = por %p1156_p12, %p1155_p6 }
 0x405   : > { %p1153_p4 = pneg %p1152_p1 }
 0x407   : > { %p1158_p8 = pnand %p1157_p3, %p1153_p4 }
 0x409   : > { %1161 = shalt.err (!%p1158_p8)
}
 0x40a   : > { %929 = dma.vmem_to_hbm [thread:$0]  (%p1367_p7), %s747_s7, 16, %s744_s14, %s734_s18  }
 0x40b PF: > { %s758_s5 = sand.u32 1, %s1200_s23   ;;  %p1506_p9 = scmp.ne.s32.totalorder %s1498_s9, 0 }
 0x40c   : > { %p1507_p11 = scmp.ge.s32.totalorder %s1220_s28, 2  ;;  %s759_s29 = scalar_lea.sflag [#allocation8], %s758_s5 }
 0x40e   : > { %p943_p2 = pnand %p1507_p11, %p1506_p9 }
 0x410   : > { %p944_p13 = pneg %p943_p2 }
 0x412   : > { %1195 = dma.done.wait (%p944_p13), %s759_s29, 16  }
 0x413   : > { %1197 = vsyncadd (%p944_p13), %s759_s29, 4294967280  ;;  %s24_s28 = sadd.s32 1, %s1220_s28   ;;  %s1508_s23 = smov %s1204_s24 }
 0x414   : > { %p21_p0 = scmp.ge.s32.totalorder %s24_s28, 4   ;;  %s1509_s24 = smov %s1208_s25 }
 0x415   : > { %s1510_s25 = smov %s1376_s19  ;;  %s1511_s26 = smov %s1216_s27 }
 0x416   : > { %s1512_s27 = smov %s1514_s12  ;;  %23 = sbr.rel (!%p21_p0) target bundleno = 10 (0xa), region = 105 }
 0x41b   :  { %763 = vsyncpa [#allocation7], 1 }
 0x41c   :  { %765 = vsyncpa [#allocation7 + $0x1], 1 }
 0x41d   :  { %766 = vsyncpa [#allocation10], 1 }
 0x41e   :  { %767 = vsyncpa [#allocation8], 1 }
 0x41f   :  { %769 = vsyncpa [#allocation8 + $0x1], 1 }

</bundles_post_ra>
